<compile_context>
chip_gen: v6e
topology: v6e:2x2x1
jax: 0.10.0
libtpu: 0.0.40
codegen_flags: <defaults>
</compile_context>

<pallas_src>
import functools
import math

import numpy as np
import jax
import jax.numpy as jnp
from jax.experimental import pallas as pl
from jax.experimental.pallas import tpu as pltpu

IN_FEATURES = 2
HIDDEN = [256, 256, 256, 256, 256]
OUT_FEATURES = 3
W0 = 1.0
WEIGHT_DECAY = 1e-5


def _round_up(x, m):
    return ((x + m - 1) // m) * m


def _tpu_config():
    """Generation-aware (tile_m, vmem_limit_bytes, elementwise dtype)."""
    kind = ""
    try:
        kind = jax.devices()[0].device_kind.lower()
    except Exception:
        pass
    is_v5e = ("v5 lite" in kind) or ("v5e" in kind) or ("v5litepod" in kind)
    is_v7 = "v7" in kind
    if is_v7:
        # v7x: 64 MiB VMEM -> smaller tile cap + explicit budget with headroom.
        tile_m, vmem_limit = 4096, 48 * 1024 * 1024
    else:
        # v5e / v6e (128 MiB VMEM): bigger tile amortizes per-step overhead.
        tile_m, vmem_limit = 8192, 64 * 1024 * 1024
    # v5e VPU/EUP have no bf16 -> keep elementwise math in f32 there.
    elem_dtype = jnp.float32 if is_v5e else jnp.bfloat16
    return tile_m, vmem_limit, elem_dtype


TILE_M, VMEM_LIMIT, ELEM_DTYPE = _tpu_config()


def _siren_kernel(*refs, n_layers, w0):
    """Fused SIREN forward for one (tile_m, ·) batch tile.

    refs = (x_ref, w1_ref, b1_ref, ..., wL_ref, bL_ref, out_ref)
    Weight/bias blocks are identical at every grid step -> VMEM-resident.
    """
    x_ref = refs[0]
    out_ref = refs[-1]
    params = refs[1:-1]

    x = x_ref[...]                                         # (tile_m, fin_p) bf16
    for i in range(n_layers):
        w = params[2 * i][...]                             # (din_p, dout_p) bf16
        b = params[2 * i + 1][...]                         # (1, dout_p) elem dtype
        # MXU matmul: bf16 operands, f32 accumulation.
        acc = jnp.dot(x.astype(w.dtype), w, preferred_element_type=jnp.float32)
        # Bias add + activation in the generation-appropriate elementwise dtype.
        h = acc.astype(b.dtype) + b
        if i < n_layers - 1:
            # SiLU via a single tanh (one EUP op/elem; no exp overflow path).
            x = 0.5 * h * (1.0 + jnp.tanh(0.5 * h))
        else:
            x = jnp.tanh(h)
    out_ref[...] = (w0 * x).astype(out_ref.dtype)


def prepare_params(weights, biases, *, w0=W0, weight_decay=WEIGHT_DECAY,
                   elem_dtype=ELEM_DTYPE):
    """One-time padding, weight-decay folding and dtype casting of parameters.

    weights[i] is (in, out) (transposed vs torch), biases[i] is (out,).
    """
    ws_p, bs_p = [], []
    for li, (w, b) in enumerate(zip(weights, biases)):
        w = jnp.asarray(w, jnp.float32)
        b = jnp.asarray(b, jnp.float32)
        din, dout = w.shape
        # First-layer K only needs sublane alignment (2 -> 8); everything else 128.
        din_p = _round_up(din, 8) if li == 0 else _round_up(din, 128)
        dout_p = _round_up(dout, 128)
        # Exact algebraic fold of the weight-decay scalar add into the bias
        # (done in f32 before any bf16 cast):
        #   (x + c) @ W + b == x @ W + (b + c * W.sum(axis=0))
        if weight_decay > 0:
            c = weight_decay * (w0 / math.sqrt(din)) * jnp.sum(jnp.square(w))
            b = b + c * jnp.sum(w, axis=0)
        wp = jnp.zeros((din_p, dout_p), jnp.float32).at[:din, :dout].set(w)
        bp = jnp.zeros((1, dout_p), jnp.float32).at[0, :dout].set(b)
        ws_p.append(wp.astype(jnp.bfloat16))    # all layers: bf16 MXU operands
        bs_p.append(bp.astype(elem_dtype))      # bias in the elementwise dtype
    return tuple(ws_p), tuple(bs_p)


@functools.partial(jax.jit, static_argnames=("w0", "out_features", "tile_m"))
def siren_forward(x, ws_p, bs_p, *, w0=W0, out_features=OUT_FEATURES,
                  tile_m=TILE_M):
    """Batch-tiled fused forward. x: (n, in_features) float32. Returns f32."""
    n, fin = x.shape
    fin_p = ws_p[0].shape[0]
    dout_p = ws_p[-1].shape[1]
    n_layers = len(ws_p)

    n8 = _round_up(max(n, 8), 8)
    tm = min(tile_m, n8)
    n_pad = _round_up(n8, tm)
    grid = (n_pad // tm,)

    # Pad the input straight into bf16 (tiny: fin_p lanes), inside the same jit.
    x_p = jnp.zeros((n_pad, fin_p), jnp.bfloat16).at[:n, :fin].set(
        x.astype(jnp.bfloat16))

    operands = [x_p]
    for w, b in zip(ws_p, bs_p):
        operands += [w, b]

    in_specs = [pl.BlockSpec((tm, fin_p), lambda i: (i, 0))]
    # Weights/biases: whole-array blocks with a constant index_map -> DMA'd
    # once and kept VMEM-resident across all batch tiles.
    in_specs += [pl.BlockSpec(op.shape, lambda i: (0, 0)) for op in operands[1:]]
    out_spec = pl.BlockSpec((tm, dout_p), lambda i: (i, 0))

    def _nbytes(a):
        return int(np.prod(a.shape)) * jnp.dtype(a.dtype).itemsize

    matmul_macs = sum(int(w.shape[0]) * int(w.shape[1]) for w in ws_p)
    hidden_width = sum(int(w.shape[1]) for w in ws_p[:-1])
    out_dtype = jnp.bfloat16
    cost = pl.CostEstimate(
        flops=2 * n_pad * matmul_macs,
        transcendentals=n_pad * (hidden_width + dout_p),     # single tanh per elem
        bytes_accessed=sum(_nbytes(op) for op in operands)
        + n_pad * dout_p * jnp.dtype(out_dtype).itemsize,
    )

    kernel = functools.partial(_siren_kernel, n_layers=n_layers, w0=w0)

    out_p = pl.pallas_call(
        kernel,
        grid=grid,
        in_specs=in_specs,
        out_specs=out_spec,
        out_shape=jax.ShapeDtypeStruct((n_pad, dout_p), out_dtype),
        compiler_params=pltpu.CompilerParams(
            # Batch axis is independent; megacore sharding on multi-TC chips.
            # (If xprof shows an idle TensorCore on v7x, switch this axis to
            # pltpu.CORE_PARALLEL.)
            dimension_semantics=("parallel",),
            vmem_limit_bytes=VMEM_LIMIT,
        ),
        cost_estimate=cost,
    )(*operands)

    # Slice off row/lane padding; cast the tiny result back to f32 for the
    # original module's output dtype.
    return out_p[:n, :out_features].astype(jnp.float32)


def init_params(key):
    """Deterministic init matching nn.Linear default U(-1/sqrt(fan_in), +...)."""
    dims = [IN_FEATURES] + HIDDEN + [OUT_FEATURES]
    weights, biases = [], []
    for i in range(len(dims) - 1):
        din, dout = dims[i], dims[i + 1]
        key, k1, k2 = jax.random.split(key, 3)
        bound = 1.0 / math.sqrt(din)
        # stored as (in, out) — transposed vs PyTorch (out, in)
        weights.append(jax.random.uniform(k1, (din, dout), jnp.float32, -bound, bound))
        biases.append(jax.random.uniform(k2, (dout,), jnp.float32, -bound, bound))
    return weights, biases


def siren_ref(x, weights, biases, w0=W0, weight_decay=WEIGHT_DECAY):
    """Pure-JAX f32 reference mirroring the PyTorch forward exactly."""
    for i, (w, b) in enumerate(zip(weights, biases)):
        if weight_decay > 0:
            wd = weight_decay * (w0 / np.sqrt(w.shape[0]))
            x = x + wd * jnp.sum(jnp.square(w))
        x = x @ w + b
        if i < len(weights) - 1:
            x = x * jax.nn.sigmoid(x)
        else:
            x = jnp.tanh(x)
    return w0 * x


if __name__ == "__main__":
    key = jax.random.PRNGKey(0)
    key, kx = jax.random.split(key)
    # matches `x = torch.rand(10, 2)` in the reference script
    x = jax.random.uniform(kx, (10, IN_FEATURES), jnp.float32)

    weights, biases = init_params(key)
    ws_p, bs_p = prepare_params(weights, biases)

    out = jax.block_until_ready(siren_forward(x, ws_p, bs_p))
    ref = jax.block_until_ready(siren_ref(x, weights, biases))
    assert out.shape == (10, OUT_FEATURES), out.shape
    # bf16 matmul operands / activations (f32 MXU accumulation) vs f32 reference.
    np.testing.assert_allclose(np.asarray(out), np.asarray(ref), rtol=5e-2, atol=5e-2)

    # Also exercise a larger batch (multi-row-tile path inside one grid step).
    key, kx2 = jax.random.split(key)
    x2 = jax.random.uniform(kx2, (1030, IN_FEATURES), jnp.float32)
    out2 = jax.block_until_ready(siren_forward(x2, ws_p, bs_p))
    ref2 = jax.block_until_ready(siren_ref(x2, weights, biases))
    assert out2.shape == (1030, OUT_FEATURES), out2.shape
    np.testing.assert_allclose(np.asarray(out2), np.asarray(ref2), rtol=5e-2, atol=5e-2)

    print("KERNEL_OK")
</pallas_src>

<mosaic_0001>
module attributes {stable_mosaic.version = 11 : i64} {
  func.func @_siren_kernel(%arg0: i32, %arg1: memref<16x8xbf16, #tpu.memory_space<vmem>>, %arg2: memref<8x256xbf16, #tpu.memory_space<vmem>>, %arg3: memref<1x256xbf16, #tpu.memory_space<vmem>>, %arg4: memref<256x256xbf16, #tpu.memory_space<vmem>>, %arg5: memref<1x256xbf16, #tpu.memory_space<vmem>>, %arg6: memref<256x256xbf16, #tpu.memory_space<vmem>>, %arg7: memref<1x256xbf16, #tpu.memory_space<vmem>>, %arg8: memref<256x256xbf16, #tpu.memory_space<vmem>>, %arg9: memref<1x256xbf16, #tpu.memory_space<vmem>>, %arg10: memref<256x256xbf16, #tpu.memory_space<vmem>>, %arg11: memref<1x256xbf16, #tpu.memory_space<vmem>>, %arg12: memref<256x128xbf16, #tpu.memory_space<vmem>>, %arg13: memref<1x128xbf16, #tpu.memory_space<vmem>>, %arg14: memref<16x128xbf16, #tpu.memory_space<vmem>>) attributes {dimension_semantics = [#tpu.dimension_semantics<parallel>], iteration_bounds = array<i64: 1>, scalar_prefetch = 0 : i64, scratch_operands = 0 : i64, tpu.core_type = #tpu.core_type<tc>, window_params = [{transform_indices = @transform_0, window_bounds = array<i64: 16, 8>}, {pipeline_mode = #tpu.pipeline_mode<synchronous>, transform_indices = @transform_1, window_bounds = array<i64: 8, 256>}, {pipeline_mode = #tpu.pipeline_mode<synchronous>, transform_indices = @transform_2, window_bounds = array<i64: 1, 256>}, {pipeline_mode = #tpu.pipeline_mode<synchronous>, transform_indices = @transform_3, window_bounds = array<i64: 256, 256>}, {pipeline_mode = #tpu.pipeline_mode<synchronous>, transform_indices = @transform_4, window_bounds = array<i64: 1, 256>}, {pipeline_mode = #tpu.pipeline_mode<synchronous>, transform_indices = @transform_5, window_bounds = array<i64: 256, 256>}, {pipeline_mode = #tpu.pipeline_mode<synchronous>, transform_indices = @transform_6, window_bounds = array<i64: 1, 256>}, {pipeline_mode = #tpu.pipeline_mode<synchronous>, transform_indices = @transform_7, window_bounds = array<i64: 256, 256>}, {pipeline_mode = #tpu.pipeline_mode<synchronous>, transform_indices = @transform_8, window_bounds = array<i64: 1, 256>}, {pipeline_mode = #tpu.pipeline_mode<synchronous>, transform_indices = @transform_9, window_bounds = array<i64: 256, 256>}, {pipeline_mode = #tpu.pipeline_mode<synchronous>, transform_indices = @transform_10, window_bounds = array<i64: 1, 256>}, {pipeline_mode = #tpu.pipeline_mode<synchronous>, transform_indices = @transform_11, window_bounds = array<i64: 256, 128>}, {pipeline_mode = #tpu.pipeline_mode<synchronous>, transform_indices = @transform_12, window_bounds = array<i64: 1, 128>}, {transform_indices = @transform_13, window_bounds = array<i64: 16, 128>}]} {
    %c0 = arith.constant 0 : index
    %c0_0 = arith.constant 0 : index
    %0 = vector.load %arg1[%c0, %c0_0] : memref<16x8xbf16, #tpu.memory_space<vmem>>, vector<16x8xbf16>
    %c0_1 = arith.constant 0 : index
    %c0_2 = arith.constant 0 : index
    %1 = vector.load %arg2[%c0_1, %c0_2] : memref<8x256xbf16, #tpu.memory_space<vmem>>, vector<8x256xbf16>
    %c0_3 = arith.constant 0 : index
    %c0_4 = arith.constant 0 : index
    %2 = vector.load %arg3[%c0_3, %c0_4] : memref<1x256xbf16, #tpu.memory_space<vmem>>, vector<1x256xbf16>
    %cst = arith.constant dense<0.000000e+00> : vector<16x256xf32>
    %3 = tpu.matmul %0, %1, %cst {dimension_numbers = #tpu.dot_dimension_numbers<[1], [0], [0], [1], [0, 0, 1, 1], [], []>} : vector<16x8xbf16>, vector<8x256xbf16>, vector<16x256xf32> -> vector<16x256xf32>
    %4 = arith.truncf %3 : vector<16x256xf32> to vector<16x256xbf16>
    %5 = vector.broadcast %2 : vector<1x256xbf16> to vector<16x256xbf16>
    %6 = arith.addf %4, %5 : vector<16x256xbf16>
    %cst_5 = arith.constant 5.000000e-01 : bf16
    %7 = vector.broadcast %cst_5 : bf16 to vector<16x256xbf16>
    %8 = arith.mulf %7, %6 : vector<16x256xbf16>
    %cst_6 = arith.constant 5.000000e-01 : bf16
    %9 = vector.broadcast %cst_6 : bf16 to vector<16x256xbf16>
    %10 = arith.mulf %9, %6 : vector<16x256xbf16>
    %11 = math.tanh %10 : vector<16x256xbf16>
    %cst_7 = arith.constant 1.000000e+00 : bf16
    %12 = vector.broadcast %cst_7 : bf16 to vector<16x256xbf16>
    %13 = arith.addf %12, %11 : vector<16x256xbf16>
    %14 = arith.mulf %8, %13 : vector<16x256xbf16>
    %c0_8 = arith.constant 0 : index
    %c0_9 = arith.constant 0 : index
    %15 = vector.load %arg4[%c0_8, %c0_9] : memref<256x256xbf16, #tpu.memory_space<vmem>>, vector<256x256xbf16>
    %c0_10 = arith.constant 0 : index
    %c0_11 = arith.constant 0 : index
    %16 = vector.load %arg5[%c0_10, %c0_11] : memref<1x256xbf16, #tpu.memory_space<vmem>>, vector<1x256xbf16>
    %cst_12 = arith.constant dense<0.000000e+00> : vector<16x256xf32>
    %17 = tpu.matmul %14, %15, %cst_12 {dimension_numbers = #tpu.dot_dimension_numbers<[1], [0], [0], [1], [0, 0, 1, 1], [], []>} : vector<16x256xbf16>, vector<256x256xbf16>, vector<16x256xf32> -> vector<16x256xf32>
    %18 = arith.truncf %17 : vector<16x256xf32> to vector<16x256xbf16>
    %19 = vector.broadcast %16 : vector<1x256xbf16> to vector<16x256xbf16>
    %20 = arith.addf %18, %19 : vector<16x256xbf16>
    %cst_13 = arith.constant 5.000000e-01 : bf16
    %21 = vector.broadcast %cst_13 : bf16 to vector<16x256xbf16>
    %22 = arith.mulf %21, %20 : vector<16x256xbf16>
    %cst_14 = arith.constant 5.000000e-01 : bf16
    %23 = vector.broadcast %cst_14 : bf16 to vector<16x256xbf16>
    %24 = arith.mulf %23, %20 : vector<16x256xbf16>
    %25 = math.tanh %24 : vector<16x256xbf16>
    %cst_15 = arith.constant 1.000000e+00 : bf16
    %26 = vector.broadcast %cst_15 : bf16 to vector<16x256xbf16>
    %27 = arith.addf %26, %25 : vector<16x256xbf16>
    %28 = arith.mulf %22, %27 : vector<16x256xbf16>
    %c0_16 = arith.constant 0 : index
    %c0_17 = arith.constant 0 : index
    %29 = vector.load %arg6[%c0_16, %c0_17] : memref<256x256xbf16, #tpu.memory_space<vmem>>, vector<256x256xbf16>
    %c0_18 = arith.constant 0 : index
    %c0_19 = arith.constant 0 : index
    %30 = vector.load %arg7[%c0_18, %c0_19] : memref<1x256xbf16, #tpu.memory_space<vmem>>, vector<1x256xbf16>
    %cst_20 = arith.constant dense<0.000000e+00> : vector<16x256xf32>
    %31 = tpu.matmul %28, %29, %cst_20 {dimension_numbers = #tpu.dot_dimension_numbers<[1], [0], [0], [1], [0, 0, 1, 1], [], []>} : vector<16x256xbf16>, vector<256x256xbf16>, vector<16x256xf32> -> vector<16x256xf32>
    %32 = arith.truncf %31 : vector<16x256xf32> to vector<16x256xbf16>
    %33 = vector.broadcast %30 : vector<1x256xbf16> to vector<16x256xbf16>
    %34 = arith.addf %32, %33 : vector<16x256xbf16>
    %cst_21 = arith.constant 5.000000e-01 : bf16
    %35 = vector.broadcast %cst_21 : bf16 to vector<16x256xbf16>
    %36 = arith.mulf %35, %34 : vector<16x256xbf16>
    %cst_22 = arith.constant 5.000000e-01 : bf16
    %37 = vector.broadcast %cst_22 : bf16 to vector<16x256xbf16>
    %38 = arith.mulf %37, %34 : vector<16x256xbf16>
    %39 = math.tanh %38 : vector<16x256xbf16>
    %cst_23 = arith.constant 1.000000e+00 : bf16
    %40 = vector.broadcast %cst_23 : bf16 to vector<16x256xbf16>
    %41 = arith.addf %40, %39 : vector<16x256xbf16>
    %42 = arith.mulf %36, %41 : vector<16x256xbf16>
    %c0_24 = arith.constant 0 : index
    %c0_25 = arith.constant 0 : index
    %43 = vector.load %arg8[%c0_24, %c0_25] : memref<256x256xbf16, #tpu.memory_space<vmem>>, vector<256x256xbf16>
    %c0_26 = arith.constant 0 : index
    %c0_27 = arith.constant 0 : index
    %44 = vector.load %arg9[%c0_26, %c0_27] : memref<1x256xbf16, #tpu.memory_space<vmem>>, vector<1x256xbf16>
    %cst_28 = arith.constant dense<0.000000e+00> : vector<16x256xf32>
    %45 = tpu.matmul %42, %43, %cst_28 {dimension_numbers = #tpu.dot_dimension_numbers<[1], [0], [0], [1], [0, 0, 1, 1], [], []>} : vector<16x256xbf16>, vector<256x256xbf16>, vector<16x256xf32> -> vector<16x256xf32>
    %46 = arith.truncf %45 : vector<16x256xf32> to vector<16x256xbf16>
    %47 = vector.broadcast %44 : vector<1x256xbf16> to vector<16x256xbf16>
    %48 = arith.addf %46, %47 : vector<16x256xbf16>
    %cst_29 = arith.constant 5.000000e-01 : bf16
    %49 = vector.broadcast %cst_29 : bf16 to vector<16x256xbf16>
    %50 = arith.mulf %49, %48 : vector<16x256xbf16>
    %cst_30 = arith.constant 5.000000e-01 : bf16
    %51 = vector.broadcast %cst_30 : bf16 to vector<16x256xbf16>
    %52 = arith.mulf %51, %48 : vector<16x256xbf16>
    %53 = math.tanh %52 : vector<16x256xbf16>
    %cst_31 = arith.constant 1.000000e+00 : bf16
    %54 = vector.broadcast %cst_31 : bf16 to vector<16x256xbf16>
    %55 = arith.addf %54, %53 : vector<16x256xbf16>
    %56 = arith.mulf %50, %55 : vector<16x256xbf16>
    %c0_32 = arith.constant 0 : index
    %c0_33 = arith.constant 0 : index
    %57 = vector.load %arg10[%c0_32, %c0_33] : memref<256x256xbf16, #tpu.memory_space<vmem>>, vector<256x256xbf16>
    %c0_34 = arith.constant 0 : index
    %c0_35 = arith.constant 0 : index
    %58 = vector.load %arg11[%c0_34, %c0_35] : memref<1x256xbf16, #tpu.memory_space<vmem>>, vector<1x256xbf16>
    %cst_36 = arith.constant dense<0.000000e+00> : vector<16x256xf32>
    %59 = tpu.matmul %56, %57, %cst_36 {dimension_numbers = #tpu.dot_dimension_numbers<[1], [0], [0], [1], [0, 0, 1, 1], [], []>} : vector<16x256xbf16>, vector<256x256xbf16>, vector<16x256xf32> -> vector<16x256xf32>
    %60 = arith.truncf %59 : vector<16x256xf32> to vector<16x256xbf16>
    %61 = vector.broadcast %58 : vector<1x256xbf16> to vector<16x256xbf16>
    %62 = arith.addf %60, %61 : vector<16x256xbf16>
    %cst_37 = arith.constant 5.000000e-01 : bf16
    %63 = vector.broadcast %cst_37 : bf16 to vector<16x256xbf16>
    %64 = arith.mulf %63, %62 : vector<16x256xbf16>
    %cst_38 = arith.constant 5.000000e-01 : bf16
    %65 = vector.broadcast %cst_38 : bf16 to vector<16x256xbf16>
    %66 = arith.mulf %65, %62 : vector<16x256xbf16>
    %67 = math.tanh %66 : vector<16x256xbf16>
    %cst_39 = arith.constant 1.000000e+00 : bf16
    %68 = vector.broadcast %cst_39 : bf16 to vector<16x256xbf16>
    %69 = arith.addf %68, %67 : vector<16x256xbf16>
    %70 = arith.mulf %64, %69 : vector<16x256xbf16>
    %c0_40 = arith.constant 0 : index
    %c0_41 = arith.constant 0 : index
    %71 = vector.load %arg12[%c0_40, %c0_41] : memref<256x128xbf16, #tpu.memory_space<vmem>>, vector<256x128xbf16>
    %c0_42 = arith.constant 0 : index
    %c0_43 = arith.constant 0 : index
    %72 = vector.load %arg13[%c0_42, %c0_43] : memref<1x128xbf16, #tpu.memory_space<vmem>>, vector<1x128xbf16>
    %cst_44 = arith.constant dense<0.000000e+00> : vector<16x128xf32>
    %73 = tpu.matmul %70, %71, %cst_44 {dimension_numbers = #tpu.dot_dimension_numbers<[1], [0], [0], [1], [0, 0, 1, 1], [], []>} : vector<16x256xbf16>, vector<256x128xbf16>, vector<16x128xf32> -> vector<16x128xf32>
    %74 = arith.truncf %73 : vector<16x128xf32> to vector<16x128xbf16>
    %75 = vector.broadcast %72 : vector<1x128xbf16> to vector<16x128xbf16>
    %76 = arith.addf %74, %75 : vector<16x128xbf16>
    %77 = math.tanh %76 : vector<16x128xbf16>
    %cst_45 = arith.constant 1.000000e+00 : bf16
    %78 = vector.broadcast %cst_45 : bf16 to vector<16x128xbf16>
    %79 = arith.mulf %78, %77 : vector<16x128xbf16>
    %c0_46 = arith.constant 0 : index
    %c0_47 = arith.constant 0 : index
    %80 = vector.load %arg14[%c0_46, %c0_47] : memref<16x128xbf16, #tpu.memory_space<vmem>>, vector<16x128xbf16>
    tpu.vector_store %arg14[%c0_46, %c0_47], %79 {strides = array<i32>} : memref<16x128xbf16, #tpu.memory_space<vmem>>, vector<16x128xbf16>,
    return
  }
  func.func @transform_0(%arg0: i32) -> (i32, i32) {
    %c0_i32 = arith.constant 0 : i32
    %c0_i32_0 = arith.constant 0 : i32
    return %arg0, %c0_i32 : i32, i32
  }
  func.func @transform_1(%arg0: i32) -> (i32, i32) {
    %c0_i32 = arith.constant 0 : i32
    %c0_i32_0 = arith.constant 0 : i32
    %c0_i32_1 = arith.constant 0 : i32
    return %c0_i32, %c0_i32_0 : i32, i32
  }
  func.func @transform_2(%arg0: i32) -> (i32, i32) {
    %c0_i32 = arith.constant 0 : i32
    %c0_i32_0 = arith.constant 0 : i32
    %c0_i32_1 = arith.constant 0 : i32
    return %c0_i32, %c0_i32_0 : i32, i32
  }
  func.func @transform_3(%arg0: i32) -> (i32, i32) {
    %c0_i32 = arith.constant 0 : i32
    %c0_i32_0 = arith.constant 0 : i32
    %c0_i32_1 = arith.constant 0 : i32
    return %c0_i32, %c0_i32_0 : i32, i32
  }
  func.func @transform_4(%arg0: i32) -> (i32, i32) {
    %c0_i32 = arith.constant 0 : i32
    %c0_i32_0 = arith.constant 0 : i32
    %c0_i32_1 = arith.constant 0 : i32
    return %c0_i32, %c0_i32_0 : i32, i32
  }
  func.func @transform_5(%arg0: i32) -> (i32, i32) {
    %c0_i32 = arith.constant 0 : i32
    %c0_i32_0 = arith.constant 0 : i32
    %c0_i32_1 = arith.constant 0 : i32
    return %c0_i32, %c0_i32_0 : i32, i32
  }
  func.func @transform_6(%arg0: i32) -> (i32, i32) {
    %c0_i32 = arith.constant 0 : i32
    %c0_i32_0 = arith.constant 0 : i32
    %c0_i32_1 = arith.constant 0 : i32
    return %c0_i32, %c0_i32_0 : i32, i32
  }
  func.func @transform_7(%arg0: i32) -> (i32, i32) {
    %c0_i32 = arith.constant 0 : i32
    %c0_i32_0 = arith.constant 0 : i32
    %c0_i32_1 = arith.constant 0 : i32
    return %c0_i32, %c0_i32_0 : i32, i32
  }
  func.func @transform_8(%arg0: i32) -> (i32, i32) {
    %c0_i32 = arith.constant 0 : i32
    %c0_i32_0 = arith.constant 0 : i32
    %c0_i32_1 = arith.constant 0 : i32
    return %c0_i32, %c0_i32_0 : i32, i32
  }
  func.func @transform_9(%arg0: i32) -> (i32, i32) {
    %c0_i32 = arith.constant 0 : i32
    %c0_i32_0 = arith.constant 0 : i32
    %c0_i32_1 = arith.constant 0 : i32
    return %c0_i32, %c0_i32_0 : i32, i32
  }
  func.func @transform_10(%arg0: i32) -> (i32, i32) {
    %c0_i32 = arith.constant 0 : i32
    %c0_i32_0 = arith.constant 0 : i32
    %c0_i32_1 = arith.constant 0 : i32
    return %c0_i32, %c0_i32_0 : i32, i32
  }
  func.func @transform_11(%arg0: i32) -> (i32, i32) {
    %c0_i32 = arith.constant 0 : i32
    %c0_i32_0 = arith.constant 0 : i32
    %c0_i32_1 = arith.constant 0 : i32
    return %c0_i32, %c0_i32_0 : i32, i32
  }
  func.func @transform_12(%arg0: i32) -> (i32, i32) {
    %c0_i32 = arith.constant 0 : i32
    %c0_i32_0 = arith.constant 0 : i32
    %c0_i32_1 = arith.constant 0 : i32
    return %c0_i32, %c0_i32_0 : i32, i32
  }
  func.func @transform_13(%arg0: i32) -> (i32, i32) {
    %c0_i32 = arith.constant 0 : i32
    %c0_i32_0 = arith.constant 0 : i32
    return %arg0, %c0_i32 : i32, i32
  }
}

</mosaic_0001>

<bundles_post_ra>
// kernel: siren_forward.1
= control target key start
LH: loop header
LB: loop body
LE: loop exit
PB: predicated region body
PF: predicated region fallthrough
CT: control target
= control target key end

     0   :  { %18 = vsyncpa [#allocation3], 0  ;;  %s2259_s0 = inlined_call_operand.vmem [shape: bf16[16,8], index: 0, kind: input, shape index: {}]   ;;  %s2260_s1 = inlined_call_operand.vmem [shape: bf16[8,256], index: 1, kind: input, shape index: {}]   ;;  %s2261_s2 = inlined_call_operand.vmem [shape: bf16[1,256], index: 2, kind: input, shape index: {}]   ;;  %s2262_s3 = inlined_call_operand.hbm [shape: bf16[256,256], index: 3, kind: input, shape index: {}]   ;;  %s2263_s4 = inlined_call_operand.vmem [shape: bf16[1,256], index: 4, kind: input, shape index: {}]   ;;  %s2264_s5 = inlined_call_operand.hbm [shape: bf16[256,256], index: 5, kind: input, shape index: {}]   ;;  %s2265_s6 = inlined_call_operand.vmem [shape: bf16[1,256], index: 6, kind: input, shape index: {}]   ;;  %s2266_s7 = inlined_call_operand.hbm [shape: bf16[256,256], index: 7, kind: input, shape index: {}]   ;;  %s2267_s8 = inlined_call_operand.vmem [shape: bf16[1,256], index: 8, kind: input, shape index: {}]   ;;  %s2268_s9 = inlined_call_operand.hbm [shape: bf16[256,256], index: 9, kind: input, shape index: {}]   ;;  %s2269_s10 = inlined_call_operand.vmem [shape: bf16[1,256], index: 10, kind: input, shape index: {}]   ;;  %s2270_s11 = inlined_call_operand.hbm [shape: bf16[256,128], index: 11, kind: input, shape index: {}]   ;;  %s2271_s12 = inlined_call_operand.vmem [shape: bf16[1,128], index: 12, kind: input, shape index: {}]   ;;  %s2272_s13 = inlined_call_operand.vmem [shape: bf16[16,128], index: 13, kind: output, shape index: {}]  }
   0x1   :  { %19 = vsyncpa [#allocation5], 0 }
   0x2   :  { %20 = vsyncpa [#allocation8], 0  ;;  %s2096_s25 = smov [#allocation4]   ;;  %s2097_s27 = smov [#allocation7]  }
   0x3   :  { %s46_s26 = sshll.u32 %s2096_s25, 4  ;;  %s74_s28 = sshll.u32 %s2097_s27, 4  ;;  %s47_s26 = int_to_ptr.vmem [resolvable:$true] %s46_s26  ;;  %s75_s28 = int_to_ptr.vmem [resolvable:$true] %s74_s28 }
   0x4   :  { %s1998_s29 = scalar_lea.vmem %s47_s26, 4096  ;;  %p2003_p1 = scmp.lt.s32.totalorder %s47_s26, %s47_s26 }
   0x5   :  { %p1999_p0 = scmp.ne.s32.totalorder %s47_s26, %s1998_s29  ;;  %p2004_p2 = scmp.lt.s32.totalorder %s1998_s29, %s1998_s29 }
   0x7   :  { %p2005_p3 = por %p2004_p2, %p2003_p1 }
   0x9   :  { %p2006_p4 = pnand %p2005_p3, %p1999_p0 }
   0xb   :  { %2009 = shalt.err (!%p2006_p4)
}
   0xc   :  { %s2098_s30 = smov 128   ;;  %s2099_s14 = smov 8  }
   0xd   :  { %52 = dma.hbm_to_vmem [thread:$0]  %s2264_s5, 4096, %s47_s26, [#allocation5], %s2098_s30, %s2098_s30, %s2099_s14  }
   0xe   :  { %s2018_s17 = scalar_lea.vmem %s75_s28, 4096  ;;  %p2023_p6 = scmp.lt.s32.totalorder %s75_s28, %s75_s28 }
   0xf   :  { %p2019_p5 = scmp.ne.s32.totalorder %s75_s28, %s2018_s17  ;;  %p2024_p7 = scmp.lt.s32.totalorder %s2018_s17, %s2018_s17 }
  0x11   :  { %p2025_p8 = por %p2024_p7, %p2023_p6 }
  0x13   :  { %p2026_p9 = pnand %p2025_p8, %p2019_p5 }
  0x15   :  { %2029 = shalt.err (!%p2026_p9)
}
  0x16   :  { %80 = dma.hbm_to_vmem [thread:$0]  %s2268_s9, 4096, %s75_s28, [#allocation8], %s2098_s30, %s2098_s30, %s2099_s14  }
  0x17   :  { %s2100_s20 = smov [#allocation2]   ;;  %s2101_s22 = smov [#allocation6]  }
  0x18   :  { %s32_s21 = sshll.u32 %s2100_s20, 4  ;;  %s60_s23 = sshll.u32 %s2101_s22, 4  ;;  %s33_s21 = int_to_ptr.vmem [resolvable:$true] %s32_s21  ;;  %s61_s23 = int_to_ptr.vmem [resolvable:$true] %s60_s23 }
  0x19   :  { %s2038_s5 = scalar_lea.vmem %s33_s21, 4096  ;;  %p2043_p11 = scmp.lt.s32.totalorder %s33_s21, %s33_s21 }
  0x1a   :  { %p2039_p10 = scmp.ne.s32.totalorder %s33_s21, %s2038_s5  ;;  %p2044_p12 = scmp.lt.s32.totalorder %s2038_s5, %s2038_s5 }
  0x1c   :  { %p2045_p13 = por %p2044_p12, %p2043_p11 }
  0x1e   :  { %p2046_p0 = pnand %p2045_p13, %p2039_p10 }
  0x20   :  { %2049 = shalt.err (!%p2046_p0)
}
  0x21   :  { %38 = dma.hbm_to_vmem [thread:$0]  %s2262_s3, 4096, %s33_s21, [#allocation3], %s2098_s30, %s2098_s30, %s2099_s14  }
  0x22   :  { %s2058_s9 = scalar_lea.vmem %s61_s23, 4096  ;;  %p2063_p2 = scmp.lt.s32.totalorder %s61_s23, %s61_s23 }
  0x23   :  { %p2059_p1 = scmp.ne.s32.totalorder %s61_s23, %s2058_s9  ;;  %p2064_p3 = scmp.lt.s32.totalorder %s2058_s9, %s2058_s9 }
  0x25   :  { %p2065_p4 = por %p2064_p3, %p2063_p2 }
  0x27   :  { %p2066_p5 = pnand %p2065_p4, %p2059_p1 }
  0x29   :  { %2069 = shalt.err (!%p2066_p5)
}
  0x2a   :  { %66 = dma.hbm_to_vmem [thread:$0]  %s2266_s7, 4096, %s61_s23, [#allocation5], %s2098_s30, %s2098_s30, %s2099_s14  }
  0x2b   :  { %s2102_s28 = smov [#allocation9]  }
  0x2c   :  { %s88_s29 = sshll.u32 %s2102_s28, 4  ;;  %s89_s29 = int_to_ptr.vmem [resolvable:$true] %s88_s29 }
  0x2d   :  { %s2078_s15 = scalar_lea.vmem %s89_s29, 2048  ;;  %p2083_p7 = scmp.lt.s32.totalorder %s89_s29, %s89_s29 }
  0x2e   :  { %p2079_p6 = scmp.ne.s32.totalorder %s89_s29, %s2078_s15  ;;  %p2084_p8 = scmp.lt.s32.totalorder %s2078_s15, %s2078_s15 }
  0x30   :  { %p2085_p9 = por %p2084_p8, %p2083_p7 }
  0x32   :  { %p2086_p10 = pnand %p2085_p9, %p2079_p6 }
  0x34   :  { %2089 = shalt.err (!%p2086_p10)
}
  0x35   :  { %s2103_s3 = smov 64   ;;  %s2104_s16 = smov 4  }
  0x36   :  { %94 = dma.hbm_to_vmem [thread:$0]  %s2270_s11, 2048, %s89_s29, [#allocation8], %s2103_s3, %s2103_s3, %s2104_s16  }
  0x37   :  { %2090 = dma.done.wait [#allocation3], 4096  }
  0x38   :  { %2091 = vsyncadd [#allocation3], 4294963200 }
  0x39   :  { %2092 = dma.done.wait [#allocation5], 8192  }
  0x3a   :  { %2093 = vsyncadd [#allocation5], 4294959104 }
  0x3b   :  { %2094 = dma.done.wait [#allocation8], 6144  }
  0x3c   :  { %2095 = vsyncadd [#allocation8], 4294961152  ;;  %v2105_v0 = vmov 0   ;;  %v117_v1 = vld [vmem:[%s2260_s1] sm:$0xff]  ;;  %vm133_vm0 = vcmask 1043456   ;;  %vm129_vm1 = vcmask 64512   ;;  %v197_v56 = vlaneseq }
  0x3d   :  { %172 = vmatprep.mubr.bf16.mxu0 %v2105_v0  ;;  %v1570_v2 = vcombine.high %v117_v1, %v117_v1  ;;  %v1569_v3 = vcombine.low %v117_v1, %v117_v1  ;;  %v1760_v4 = vld [vmem:[#allocation2 + $0x74] ss:$8 sps:$4 sm:$0xff]   ;;  %v1762_v5 = vld [vmem:[#allocation2 + $0x70] ss:$8 sps:$4 sm:$0xff]   ;;  %v1759_v7 = vld [vmem:[%s2259_s0] sm:$0xff]  }
  0x3e   :  { %v1763_v8 = vld [vmem:[#allocation2 + $0x64] ss:$8 sps:$4 sm:$0xff]   ;;  %425 = vmatprep.subr.bf16.mxu1 %v1760_v4  ;;  %v1765_v9 = vld [vmem:[#allocation2 + $0x60] ss:$8 sps:$4 sm:$0xff]   ;;  %v1766_v10 = vld [vmem:[#allocation2 + $0x54] ss:$8 sps:$4 sm:$0xff]  }
  0x3f   :  { %1571 = vmatprep.subr.msk.bf16.mxu0 %vm133_vm0, %v1570_v2  ;;  %v135_v6 = vsel %vm133_vm0, %v1569_v3, 0  ;;  %426 = vmatpush1.bf16.msra.mxu1 %v1762_v5  ;;  %v1768_v11 = vld [vmem:[#allocation2 + $0x50] ss:$8 sps:$4 sm:$0xff]   ;;  %v1769_v12 = vld [vmem:[#allocation2 + $0x44] ss:$8 sps:$4 sm:$0xff]   ;;  %v198_v58 = vshrl.u32 %v197_v56, 7 }
  0x40   :  { %155 = vmatpush1.bf16.msra.mxu0 %v135_v6  ;;  %427 = vmatprep.subr.bf16.mxu1 %v1763_v8  ;;  %v1771_v13 = vld [vmem:[#allocation2 + $0x40] ss:$8 sps:$4 sm:$0xff]   ;;  %v1772_v14 = vld [vmem:[#allocation2 + $0x34] ss:$8 sps:$4 sm:$0xff]   ;;  %v1774_v15 = vld [vmem:[#allocation2 + $0x30] ss:$8 sps:$4 sm:$0xff]  }
  0x41   :  { %v1775_v16 = vld [vmem:[#allocation2 + $0x24] ss:$8 sps:$4 sm:$0xff]   ;;  %v1777_v17 = vld [vmem:[#allocation2 + $0x20] ss:$8 sps:$4 sm:$0xff]   ;;  %v1778_v18 = vld [vmem:[#allocation2 + $0x14] ss:$8 sps:$4 sm:$0xff]  }
  0x42   :  { %v1780_v19 = vld [vmem:[#allocation2 + $0x10] ss:$8 sps:$4 sm:$0xff]   ;;  %v1781_v20 = vld [vmem:[#allocation2 + $0x4] ss:$8 sps:$4 sm:$0xff]   ;;  %v1783_v21 = vld [vmem:[#allocation2] ss:$8 sps:$4 sm:$0xff]  }
  0x43   :  { %1572 = vmatmul.mubr.msk.bf16.vlgmr.msra.gmra.mxu0 %vm129_vm1, %v1759_v7  ;;  %428 = vmatpush1.bf16.msra.mxu1 %v1765_v9  ;;  %v1784_v22 = vld [vmem:[#allocation2 + $0xf4] ss:$8 sps:$4 sm:$0xff]   ;;  %v1786_v23 = vld [vmem:[#allocation2 + $0xf0] ss:$8 sps:$4 sm:$0xff]   ;;  %v1787_v24 = vld [vmem:[#allocation2 + $0xe4] ss:$8 sps:$4 sm:$0xff]  }
  0x44   :  { %429 = vmatprep.subr.bf16.mxu1 %v1766_v10  ;;  %v1789_v25 = vld [vmem:[#allocation2 + $0xe0] ss:$8 sps:$4 sm:$0xff]   ;;  %v1790_v26 = vld [vmem:[#allocation2 + $0xd4] ss:$8 sps:$4 sm:$0xff]   ;;  %v1792_v27 = vld [vmem:[#allocation2 + $0xd0] ss:$8 sps:$4 sm:$0xff]  }
  0x45   :  { %v1793_v28 = vld [vmem:[#allocation2 + $0xc4] ss:$8 sps:$4 sm:$0xff]   ;;  %v1795_v29 = vld [vmem:[#allocation2 + $0xc0] ss:$8 sps:$4 sm:$0xff]   ;;  %v1796_v30 = vld [vmem:[#allocation2 + $0xb4] ss:$8 sps:$4 sm:$0xff]  }
  0x46   :  { %v1798_v31 = vld [vmem:[#allocation2 + $0xb0] ss:$8 sps:$4 sm:$0xff]   ;;  %v1799_v32 = vld [vmem:[#allocation2 + $0xa4] ss:$8 sps:$4 sm:$0xff]   ;;  %v1801_v33 = vld [vmem:[#allocation2 + $0xa0] ss:$8 sps:$4 sm:$0xff]  }
  0x47   :  { %430 = vmatpush1.bf16.msra.mxu1 %v1768_v11  ;;  %v1802_v34 = vld [vmem:[#allocation2 + $0x94] ss:$8 sps:$4 sm:$0xff]   ;;  %v1804_v35 = vld [vmem:[#allocation2 + $0x90] ss:$8 sps:$4 sm:$0xff]   ;;  %v1805_v36 = vld [vmem:[#allocation2 + $0x84] ss:$8 sps:$4 sm:$0xff]  }
  0x48   :  { %431 = vmatprep.subr.bf16.mxu1 %v1769_v12  ;;  %v1807_v37 = vld [vmem:[#allocation2 + $0x80] ss:$8 sps:$4 sm:$0xff]   ;;  %v1808_v38 = vld [vmem:[#allocation4 + $0x70] ss:$8 sps:$4 sm:$0xff]   ;;  %v1810_v39 = vld [vmem:[#allocation4 + $0x74] ss:$8 sps:$4 sm:$0xff]  }
  0x49   :  { %v1813_v40 = vld [vmem:[#allocation4 + $0x64] ss:$8 sps:$4 sm:$0xff]   ;;  %710 = vmatprep.subr.bf16.mxu0 %v1810_v39  ;;  %v1811_v41 = vld [vmem:[#allocation4 + $0x60] ss:$8 sps:$4 sm:$0xff]   ;;  %v1816_v42 = vld [vmem:[#allocation4 + $0x54] ss:$8 sps:$4 sm:$0xff]  }
  0x4a   :  { %711 = vmatpush1.bf16.msra.mxu0 %v1808_v38  ;;  %v1814_v43 = vld [vmem:[#allocation4 + $0x50] ss:$8 sps:$4 sm:$0xff]   ;;  %v1819_v44 = vld [vmem:[#allocation4 + $0x44] ss:$8 sps:$4 sm:$0xff]   ;;  %v1817_v45 = vld [vmem:[#allocation4 + $0x40] ss:$8 sps:$4 sm:$0xff]  }
  0x4b   :  { %432 = vmatpush1.bf16.msra.mxu1 %v1771_v13  ;;  %712 = vmatprep.subr.bf16.mxu0 %v1813_v40  ;;  %v1822_v46 = vld [vmem:[#allocation4 + $0x34] ss:$8 sps:$4 sm:$0xff]   ;;  %v1820_v47 = vld [vmem:[#allocation4 + $0x30] ss:$8 sps:$4 sm:$0xff]   ;;  %v1825_v48 = vld [vmem:[#allocation4 + $0x24] ss:$8 sps:$4 sm:$0xff]  }
  0x4c   :  { %433 = vmatprep.subr.bf16.mxu1 %v1772_v14  ;;  %v1823_v49 = vld [vmem:[#allocation4 + $0x20] ss:$8 sps:$4 sm:$0xff]   ;;  %v1828_v50 = vld [vmem:[#allocation4 + $0x14] ss:$8 sps:$4 sm:$0xff]   ;;  %v1826_v51 = vld [vmem:[#allocation4 + $0x10] ss:$8 sps:$4 sm:$0xff]  }
  0x4d   :  { %v1831_v52 = vld [vmem:[#allocation4 + $0x4] ss:$8 sps:$4 sm:$0xff]   ;;  %v1829_v53 = vld [vmem:[#allocation4] ss:$8 sps:$4 sm:$0xff]   ;;  %v2106_v54 = vmov 1966171168  }
  0x4e   :  { %713 = vmatpush1.bf16.msra.mxu0 %v1811_v41  ;;  %v195_v55 = vunpack.c.l.s4 %v2106_v54  ;;  %v1573_v59 = vld.sshfl [vmem:[%s2261_s2] sm:$0x11 pattern:$0x75316420]  ;;  %v2217_v1 = vsub.s32 0, %v198_v58 }
  0x4f   :  { %434 = vmatpush1.bf16.msra.mxu1 %v1774_v15  ;;  %714 = vmatprep.subr.bf16.mxu0 %v1816_v42  ;;  %v193_v61 = vcombine.high %v1573_v59, %v1573_v59  ;;  %v1858_v38 = vld [vmem:[#allocation6 + $0x74] ss:$8 sps:$4 sm:$0xff]   ;;  %v1861_v39 = vld [vmem:[#allocation6 + $0x64] ss:$8 sps:$4 sm:$0xff]   ;;  %v1859_v40 = vld [vmem:[#allocation6 + $0x60] ss:$8 sps:$4 sm:$0xff]  }
  0x50   :  { %435 = vmatprep.subr.bf16.mxu1 %v1775_v16  ;;  %v196_v57 = vunpack.c.0.s8 %v195_v55  ;;  %v1864_v41 = vld [vmem:[#allocation6 + $0x54] ss:$8 sps:$4 sm:$0xff]   ;;  %v1862_v42 = vld [vmem:[#allocation6 + $0x50] ss:$8 sps:$4 sm:$0xff]  }
  0x52   :  { %715 = vmatpush1.bf16.msra.mxu0 %v1814_v43  ;;  %v2213_v60 = vsub.s32 %v196_v57, %v198_v58  ;;  %v1867_v43 = vld [vmem:[#allocation6 + $0x44] ss:$8 sps:$4 sm:$0xff]  }
  0x53   :  { %436 = vmatpush1.bf16.msra.mxu1 %v1777_v17  ;;  %716 = vmatprep.subr.bf16.mxu0 %v1819_v44  ;;  %v1865_v44 = vld [vmem:[#allocation6 + $0x40] ss:$8 sps:$4 sm:$0xff]  }
  0x54   :  { %437 = vmatprep.subr.bf16.mxu1 %v1778_v18  ;;  %v200_v62 = vrot.slane %v1573_v59, %v2213_v60  ;;  %v207_v63 = vrot.slane %v193_v61, %v2213_v60 }
  0x56   :  { %717 = vmatpush1.bf16.msra.mxu0 %v1817_v45  ;;  %v209_v0 = vpack.i.b16 %v200_v62, %v200_v62  ;;  %v216_v3 = vpack.i.b16 %v207_v63, %v207_v63  ;;  %v1870_v45 = vld [vmem:[#allocation6 + $0x34] ss:$8 sps:$4 sm:$0xff]  }
  0x57   :  { %438 = vmatpush1.bf16.msra.mxu1 %v1780_v19  ;;  %718 = vmatprep.subr.bf16.mxu0 %v1822_v46  ;;  %v1868_v46 = vld [vmem:[#allocation6 + $0x30] ss:$8 sps:$4 sm:$0xff]  }
  0x58   :  { %439 = vmatprep.subr.bf16.mxu1 %v1781_v20  ;;  %v214_v5 = vrot.slane %v209_v0, %v2217_v1  ;;  %v221_v8 = vrot.slane %v216_v3, %v2217_v1 }
  0x5a   :  { %719 = vmatpush1.bf16.msra.mxu0 %v1820_v47  ;;  %v1873_v47 = vld [vmem:[#allocation6 + $0x24] ss:$8 sps:$4 sm:$0xff]  }
  0x5b   :  { %440 = vmatpush1.bf16.msra.mxu1 %v1783_v21  ;;  %720 = vmatprep.subr.bf16.mxu0 %v1825_v48  ;;  %v1834_v21 = vld [vmem:[#allocation4 + $0xf4] ss:$8 sps:$4 sm:$0xff]   ;;  %v1871_v48 = vld [vmem:[#allocation6 + $0x20] ss:$8 sps:$4 sm:$0xff]  }
  0x5c   :  { %441 = vmatprep.subr.bf16.mxu1 %v1784_v22  ;;  %v1832_v22 = vld [vmem:[#allocation4 + $0xf0] ss:$8 sps:$4 sm:$0xff]  }
  0x5e   :  { %721 = vmatpush1.bf16.msra.mxu0 %v1823_v49  ;;  %v1876_v49 = vld [vmem:[#allocation6 + $0x14] ss:$8 sps:$4 sm:$0xff]  }
  0x5f   :  { %442 = vmatpush2.bf16.msra.mxu1 %v1786_v23  ;;  %722 = vmatprep.subr.bf16.mxu0 %v1828_v50  ;;  %v1837_v23 = vld [vmem:[#allocation4 + $0xe4] ss:$8 sps:$4 sm:$0xff]   ;;  %v1874_v50 = vld [vmem:[#allocation6 + $0x10] ss:$8 sps:$4 sm:$0xff]  }
  0x60   :  { %443 = vmatprep.subr.bf16.mxu1 %v1787_v24  ;;  %v1835_v24 = vld [vmem:[#allocation4 + $0xe0] ss:$8 sps:$4 sm:$0xff]  }
  0x62   :  { %723 = vmatpush1.bf16.msra.mxu0 %v1826_v51  ;;  %v1879_v51 = vld [vmem:[#allocation6 + $0x4] ss:$8 sps:$4 sm:$0xff]  }
  0x63   :  { %444 = vmatpush2.bf16.msra.mxu1 %v1789_v25  ;;  %724 = vmatprep.subr.bf16.mxu0 %v1831_v52  ;;  %v1840_v25 = vld [vmem:[#allocation4 + $0xd4] ss:$8 sps:$4 sm:$0xff]   ;;  %v1877_v52 = vld [vmem:[#allocation6] ss:$8 sps:$4 sm:$0xff]  }
  0x64   :  { %445 = vmatprep.subr.bf16.mxu1 %v1790_v26  ;;  %v1838_v26 = vld [vmem:[#allocation4 + $0xd0] ss:$8 sps:$4 sm:$0xff]  }
  0x66   :  { %725 = vmatpush1.bf16.msra.mxu0 %v1829_v53  ;;  %v1606_v53 = vld.sshfl [vmem:[%s2263_s4] sm:$0x11 pattern:$0x75316420] }
  0x67   :  { %446 = vmatpush2.bf16.msra.mxu1 %v1792_v27  ;;  %726 = vmatprep.subr.bf16.mxu0 %v1834_v21  ;;  %v1843_v27 = vld [vmem:[#allocation4 + $0xc4] ss:$8 sps:$4 sm:$0xff]   ;;  %v478_v54 = vcombine.high %v1606_v53, %v1606_v53  ;;  %v485_v55 = vrot.slane %v1606_v53, %v2213_v60 }
  0x68   :  { %447 = vmatprep.subr.bf16.mxu1 %v1793_v28  ;;  %v1841_v28 = vld [vmem:[#allocation4 + $0xc0] ss:$8 sps:$4 sm:$0xff]   ;;  %v1891_v21 = vld [vmem:[#allocation6 + $0xc4] ss:$8 sps:$4 sm:$0xff]  }
  0x69   :  { %v492_v56 = vrot.slane %v478_v54, %v2213_v60  ;;  %v494_v57 = vpack.i.b16 %v485_v55, %v485_v55 }
  0x6a   :  { %727 = vmatpush2.bf16.msra.mxu0 %v1832_v22  ;;  %v1889_v22 = vld [vmem:[#allocation6 + $0xc0] ss:$8 sps:$4 sm:$0xff]  }
  0x6b   :  { %448 = vmatpush2.bf16.msra.mxu1 %v1795_v29  ;;  %728 = vmatprep.subr.bf16.mxu0 %v1837_v23  ;;  %v1846_v29 = vld [vmem:[#allocation4 + $0xb4] ss:$8 sps:$4 sm:$0xff]   ;;  %v501_v59 = vpack.i.b16 %v492_v56, %v492_v56  ;;  %v499_v62 = vrot.slane %v494_v57, %v2217_v1 }
  0x6c   :  { %449 = vmatprep.subr.bf16.mxu1 %v1796_v30  ;;  %v1844_v30 = vld [vmem:[#allocation4 + $0xb0] ss:$8 sps:$4 sm:$0xff]   ;;  %v1894_v23 = vld [vmem:[#allocation6 + $0xb4] ss:$8 sps:$4 sm:$0xff]  }
  0x6e   :  { %729 = vmatpush2.bf16.msra.mxu0 %v1835_v24  ;;  %v1892_v24 = vld [vmem:[#allocation6 + $0xb0] ss:$8 sps:$4 sm:$0xff]  }
  0x6f   :  { %450 = vmatpush2.bf16.msra.mxu1 %v1798_v31  ;;  %730 = vmatprep.subr.bf16.mxu0 %v1840_v25  ;;  %v1849_v31 = vld [vmem:[#allocation4 + $0xa4] ss:$8 sps:$4 sm:$0xff]  }
  0x70   :  { %451 = vmatprep.subr.bf16.mxu1 %v1799_v32  ;;  %v1847_v32 = vld [vmem:[#allocation4 + $0xa0] ss:$8 sps:$4 sm:$0xff]   ;;  %v1897_v25 = vld [vmem:[#allocation6 + $0xa4] ss:$8 sps:$4 sm:$0xff]  }
  0x72   :  { %731 = vmatpush2.bf16.msra.mxu0 %v1838_v26  ;;  %v1895_v26 = vld [vmem:[#allocation6 + $0xa0] ss:$8 sps:$4 sm:$0xff]  }
  0x73   :  { %452 = vmatpush2.bf16.msra.mxu1 %v1801_v33  ;;  %732 = vmatprep.subr.bf16.mxu0 %v1843_v27  ;;  %v1852_v33 = vld [vmem:[#allocation4 + $0x94] ss:$8 sps:$4 sm:$0xff]  }
  0x74   :  { %453 = vmatprep.subr.bf16.mxu1 %v1802_v34  ;;  %v1850_v34 = vld [vmem:[#allocation4 + $0x90] ss:$8 sps:$4 sm:$0xff]   ;;  %v1900_v27 = vld [vmem:[#allocation6 + $0x94] ss:$8 sps:$4 sm:$0xff]  }
  0x76   :  { %733 = vmatpush2.bf16.msra.mxu0 %v1841_v28  ;;  %v1898_v28 = vld [vmem:[#allocation6 + $0x90] ss:$8 sps:$4 sm:$0xff]  }
  0x77   :  { %454 = vmatpush2.bf16.msra.mxu1 %v1804_v35  ;;  %734 = vmatprep.subr.bf16.mxu0 %v1846_v29  ;;  %v1855_v35 = vld [vmem:[#allocation4 + $0x84] ss:$8 sps:$4 sm:$0xff]  }
  0x78   :  { %455 = vmatprep.subr.bf16.mxu1 %v1805_v36  ;;  %v1853_v36 = vld [vmem:[#allocation4 + $0x80] ss:$8 sps:$4 sm:$0xff]   ;;  %v1903_v29 = vld [vmem:[#allocation6 + $0x84] ss:$8 sps:$4 sm:$0xff]  }
  0x7a   :  { %735 = vmatpush2.bf16.msra.mxu0 %v1844_v30  ;;  %v1901_v30 = vld [vmem:[#allocation6 + $0x80] ss:$8 sps:$4 sm:$0xff]  }
  0x7b   :  { %456 = vmatpush2.bf16.msra.mxu1 %v1807_v37  ;;  %736 = vmatprep.subr.bf16.mxu0 %v1849_v31  ;;  %v1856_v37 = vld [vmem:[#allocation6 + $0x70] ss:$8 sps:$4 sm:$0xff]  }
  0x7c   :  { %995 = vmatprep.subr.bf16.mxu1 %v1858_v38  ;;  %v1904_v31 = vld [vmem:[#allocation7 + $0x70] ss:$8 sps:$4 sm:$0xff]   ;;  %v1913_v38 = vld [vmem:[#allocation7 + $0x40] ss:$8 sps:$4 sm:$0xff]  }
  0x7e   :  { %737 = vmatpush2.bf16.msra.mxu0 %v1847_v32  ;;  %v1906_v32 = vld [vmem:[#allocation7 + $0x74] ss:$8 sps:$4 sm:$0xff]  }
  0x7f   :  { %738 = vmatprep.subr.bf16.mxu0 %v1852_v33  ;;  %v1909_v33 = vld [vmem:[#allocation7 + $0x64] ss:$8 sps:$4 sm:$0xff]  }
  0x82   :  { %739 = vmatpush2.bf16.msra.mxu0 %v1850_v34  ;;  %v1907_v34 = vld [vmem:[#allocation7 + $0x60] ss:$8 sps:$4 sm:$0xff]  }
  0x83   :  { %740 = vmatprep.subr.bf16.mxu0 %v1855_v35  ;;  %v1912_v35 = vld [vmem:[#allocation7 + $0x54] ss:$8 sps:$4 sm:$0xff]  }
  0x86   :  { %741 = vmatpush2.bf16.msra.mxu0 %v1853_v36  ;;  %v1910_v36 = vld [vmem:[#allocation7 + $0x50] ss:$8 sps:$4 sm:$0xff]  }
  0x87   :  { %1280 = vmatprep.subr.bf16.mxu0 %v1906_v32 }
 0x103   :  { %v174_v2 = vpop.f32.mrf.mxu0 }
 0x105   :  { %v176_v4 = vpop.f32.mrf.mxu0 }
 0x107   :  { %v178_v6 = vpop.f32.mrf.mxu0 }
 0x108   :  { %v183_v7 = vpack.c.bf16 %v178_v6, %v174_v2  ;;  %v506_v2 = vrot.slane %v501_v59, %v2217_v1 }
 0x109   :  { %v180_v9 = vpop.f32.mrf.mxu0 }
 0x10a   :  { %v222_v10 = vadd.bf16 %v214_v5, %v183_v7  ;;  %v184_v11 = vpack.c.bf16 %v180_v9, %v176_v4 }
 0x10c   :  { %v224_v12 = vmul.bf16 1056980736, %v222_v10  ;;  %v223_v13 = vadd.bf16 %v221_v8, %v184_v11 }
 0x10e   :  { %1968 = vtanh.bf16 %v224_v12  ;;  %v225_v14 = vmul.bf16 1056980736, %v223_v13 }
 0x110   :  { %1970 = vtanh.bf16 %v225_v14 }
 0x11c   :  { %v1969_v15 = vpop.eup %1968 }
 0x11d   :  { %v228_v17 = vadd.bf16 1065369472, %v1969_v15  ;;  %v1882_v15 = vld [vmem:[#allocation6 + $0xf4] ss:$8 sps:$4 sm:$0xff]  }
 0x11e   :  { %v1971_v16 = vpop.eup %1970 }
 0x11f   :  { %v229_v18 = vadd.bf16 1065369472, %v1971_v16  ;;  %v230_v20 = vmul.bf16 %v228_v17, %v224_v12  ;;  %v1880_v16 = vld [vmem:[#allocation6 + $0xf0] ss:$8 sps:$4 sm:$0xff]   ;;  %v1885_v17 = vld [vmem:[#allocation6 + $0xe4] ss:$8 sps:$4 sm:$0xff]  }
 0x121   :  { %v231_v19 = vmul.bf16 %v229_v18, %v225_v14  ;;  %v1883_v18 = vld [vmem:[#allocation6 + $0xe0] ss:$8 sps:$4 sm:$0xff]  }
 0x123   :  { %457 = vmatprep.mubr.bf16.mxu1 %v231_v19  ;;  %v1888_v19 = vld [vmem:[#allocation6 + $0xd4] ss:$8 sps:$4 sm:$0xff]  }
 0x124   :  { %458 = vmatmul.mubr.bf16.vlgmr.msra.gmra.mxu1 %v230_v20  ;;  %v1886_v20 = vld [vmem:[#allocation6 + $0xd0] ss:$8 sps:$4 sm:$0xff]  }
 0x125   :  { %996 = vmatpush1.bf16.msra.mxu1 %v1856_v37  ;;  %v1915_v37 = vld [vmem:[#allocation7 + $0x44] ss:$8 sps:$4 sm:$0xff]  }
 0x126   :  { %997 = vmatprep.subr.bf16.mxu1 %v1861_v39  ;;  %v1918_v39 = vld [vmem:[#allocation7 + $0x34] ss:$8 sps:$4 sm:$0xff]  }
 0x129   :  { %998 = vmatpush1.bf16.msra.mxu1 %v1859_v40  ;;  %v1916_v40 = vld [vmem:[#allocation7 + $0x30] ss:$8 sps:$4 sm:$0xff]  }
 0x12a   :  { %999 = vmatprep.subr.bf16.mxu1 %v1864_v41  ;;  %v1921_v41 = vld [vmem:[#allocation7 + $0x24] ss:$8 sps:$4 sm:$0xff]  }
 0x12d   :  { %1000 = vmatpush1.bf16.msra.mxu1 %v1862_v42  ;;  %v1919_v42 = vld [vmem:[#allocation7 + $0x20] ss:$8 sps:$4 sm:$0xff]  }
 0x12e   :  { %1001 = vmatprep.subr.bf16.mxu1 %v1867_v43  ;;  %v1924_v43 = vld [vmem:[#allocation7 + $0x14] ss:$8 sps:$4 sm:$0xff]  }
 0x131   :  { %1002 = vmatpush1.bf16.msra.mxu1 %v1865_v44  ;;  %v1922_v44 = vld [vmem:[#allocation7 + $0x10] ss:$8 sps:$4 sm:$0xff]  }
 0x132   :  { %1003 = vmatprep.subr.bf16.mxu1 %v1870_v45  ;;  %v1927_v45 = vld [vmem:[#allocation7 + $0x4] ss:$8 sps:$4 sm:$0xff]  }
 0x135   :  { %1004 = vmatpush1.bf16.msra.mxu1 %v1868_v46  ;;  %v1925_v46 = vld [vmem:[#allocation7] ss:$8 sps:$4 sm:$0xff]  }
 0x136   :  { %1005 = vmatprep.subr.bf16.mxu1 %v1873_v47  ;;  %v1639_v47 = vld.sshfl [vmem:[%s2265_s6] sm:$0x11 pattern:$0x75316420] }
 0x139   :  { %1006 = vmatpush1.bf16.msra.mxu1 %v1871_v48  ;;  %v763_v48 = vcombine.high %v1639_v47, %v1639_v47 }
 0x13a   :  { %1007 = vmatprep.subr.bf16.mxu1 %v1876_v49  ;;  %v770_v49 = vrot.slane %v1639_v47, %v2213_v60 }
 0x13d   :  { %1008 = vmatpush1.bf16.msra.mxu1 %v1874_v50  ;;  %v777_v50 = vrot.slane %v763_v48, %v2213_v60 }
 0x13e   :  { %1009 = vmatprep.subr.bf16.mxu1 %v1879_v51  ;;  %v779_v51 = vpack.i.b16 %v770_v49, %v770_v49  ;;  %v1952_v49 = vld [vmem:[#allocation9 + $0x78] sm:$0xff]  }
 0x13f   :  { %v786_v53 = vpack.i.b16 %v777_v50, %v777_v50  ;;  %v1953_v50 = vld [vmem:[#allocation9 + $0x38] sm:$0xff]  }
 0x140   :  { %v784_v55 = vrot.slane %v779_v51, %v2217_v1  ;;  %v1954_v51 = vld [vmem:[#allocation9 + $0x70] sm:$0xff]  }
 0x141   :  { %1010 = vmatpush1.bf16.msra.mxu1 %v1877_v52 }
 0x142   :  { %1011 = vmatprep.subr.bf16.mxu1 %v1882_v15  ;;  %v1939_v15 = vld [vmem:[#allocation7 + $0xc4] ss:$8 sps:$4 sm:$0xff]  }
 0x145   :  { %1012 = vmatpush2.bf16.msra.mxu1 %v1880_v16  ;;  %v1937_v16 = vld [vmem:[#allocation7 + $0xc0] ss:$8 sps:$4 sm:$0xff]  }
 0x146   :  { %1013 = vmatprep.subr.bf16.mxu1 %v1885_v17  ;;  %v1942_v17 = vld [vmem:[#allocation7 + $0xb4] ss:$8 sps:$4 sm:$0xff]  }
 0x149   :  { %1014 = vmatpush2.bf16.msra.mxu1 %v1883_v18  ;;  %v1940_v18 = vld [vmem:[#allocation7 + $0xb0] ss:$8 sps:$4 sm:$0xff]  }
 0x14a   :  { %1015 = vmatprep.subr.bf16.mxu1 %v1888_v19  ;;  %v1945_v19 = vld [vmem:[#allocation7 + $0xa4] ss:$8 sps:$4 sm:$0xff]  }
 0x14d   :  { %1016 = vmatpush2.bf16.msra.mxu1 %v1886_v20  ;;  %v1943_v20 = vld [vmem:[#allocation7 + $0xa0] ss:$8 sps:$4 sm:$0xff]  }
 0x14e   :  { %1017 = vmatprep.subr.bf16.mxu1 %v1891_v21  ;;  %v1948_v21 = vld [vmem:[#allocation7 + $0x94] ss:$8 sps:$4 sm:$0xff]  }
 0x151   :  { %1018 = vmatpush2.bf16.msra.mxu1 %v1889_v22  ;;  %v1946_v22 = vld [vmem:[#allocation7 + $0x90] ss:$8 sps:$4 sm:$0xff]  }
 0x152   :  { %1019 = vmatprep.subr.bf16.mxu1 %v1894_v23  ;;  %v1951_v23 = vld [vmem:[#allocation7 + $0x84] ss:$8 sps:$4 sm:$0xff]  }
 0x155   :  { %1020 = vmatpush2.bf16.msra.mxu1 %v1892_v24  ;;  %v1949_v24 = vld [vmem:[#allocation7 + $0x80] ss:$8 sps:$4 sm:$0xff]  }
 0x156   :  { %1021 = vmatprep.subr.bf16.mxu1 %v1897_v25  ;;  %v1672_v25 = vld.sshfl [vmem:[%s2267_s8] sm:$0x11 pattern:$0x75316420] }
 0x159   :  { %1022 = vmatpush2.bf16.msra.mxu1 %v1895_v26  ;;  %v1048_v26 = vcombine.high %v1672_v25, %v1672_v25 }
 0x15a   :  { %1023 = vmatprep.subr.bf16.mxu1 %v1900_v27  ;;  %v1055_v27 = vrot.slane %v1672_v25, %v2213_v60 }
 0x15d   :  { %1024 = vmatpush2.bf16.msra.mxu1 %v1898_v28  ;;  %v1062_v28 = vrot.slane %v1048_v26, %v2213_v60 }
 0x15e   :  { %1025 = vmatprep.subr.bf16.mxu1 %v1903_v29  ;;  %v1064_v29 = vpack.i.b16 %v1055_v27, %v1055_v27  ;;  %v1404_v27 = vld [vmem:[%s2271_s12] sm:$0x1] }
 0x161   :  { %1026 = vmatpush2.bf16.msra.mxu1 %v1901_v30 }
 0x162   :  { %1724 = vmatprep.subr.bf16.mxu1 %v1952_v49 }
 0x1e4   :  { %v459_v58 = vpop.f32.mrf.mxu1 }
 0x1e6   :  { %v461_v61 = vpop.f32.mrf.mxu1 }
 0x1e8   :  { %v463_v63 = vpop.f32.mrf.mxu1 }
 0x1e9   :  { %v468_v0 = vpack.c.bf16 %v463_v63, %v459_v58  ;;  %v791_v58 = vrot.slane %v786_v53, %v2217_v1  ;;  %v1956_v53 = vld [vmem:[#allocation9 + $0x68] sm:$0xff]  }
 0x1ea   :  { %v465_v3 = vpop.f32.mrf.mxu1 }
 0x1eb   :  { %v507_v4 = vadd.bf16 %v499_v62, %v468_v0  ;;  %v469_v5 = vpack.c.bf16 %v465_v3, %v461_v61 }
 0x1ed   :  { %v509_v6 = vmul.bf16 1056980736, %v507_v4  ;;  %v508_v7 = vadd.bf16 %v506_v2, %v469_v5 }
 0x1ef   :  { %1972 = vtanh.bf16 %v509_v6  ;;  %v510_v8 = vmul.bf16 1056980736, %v508_v7 }
 0x1f1   :  { %1974 = vtanh.bf16 %v510_v8 }
 0x1fd   :  { %v1973_v9 = vpop.eup %1972 }
 0x1fe   :  { %v513_v11 = vadd.bf16 1065369472, %v1973_v9  ;;  %v1930_v9 = vld [vmem:[#allocation7 + $0xf4] ss:$8 sps:$4 sm:$0xff]  }
 0x1ff   :  { %v1975_v10 = vpop.eup %1974 }
 0x200   :  { %v514_v12 = vadd.bf16 1065369472, %v1975_v10  ;;  %v515_v14 = vmul.bf16 %v513_v11, %v509_v6  ;;  %v1928_v10 = vld [vmem:[#allocation7 + $0xf0] ss:$8 sps:$4 sm:$0xff]   ;;  %v1933_v11 = vld [vmem:[#allocation7 + $0xe4] ss:$8 sps:$4 sm:$0xff]  }
 0x202   :  { %v516_v13 = vmul.bf16 %v514_v12, %v510_v8  ;;  %v1931_v12 = vld [vmem:[#allocation7 + $0xe0] ss:$8 sps:$4 sm:$0xff]  }
 0x204   :  { %742 = vmatprep.mubr.bf16.mxu0 %v516_v13  ;;  %v1936_v13 = vld [vmem:[#allocation7 + $0xd4] ss:$8 sps:$4 sm:$0xff]  }
 0x205   :  { %743 = vmatmul.mubr.bf16.vlgmr.msra.gmra.mxu0 %v515_v14  ;;  %v1934_v14 = vld [vmem:[#allocation7 + $0xd0] ss:$8 sps:$4 sm:$0xff]  }
 0x206   :  { %1281 = vmatpush1.bf16.msra.mxu0 %v1904_v31  ;;  %v1071_v31 = vpack.i.b16 %v1062_v28, %v1062_v28 }
 0x207   :  { %1282 = vmatprep.subr.bf16.mxu0 %v1909_v33  ;;  %v1069_v33 = vrot.slane %v1064_v29, %v2217_v1  ;;  %v1544_v29 = vpack.i.b16 %v1404_v27, %v1404_v27 }
 0x20a   :  { %1283 = vmatpush1.bf16.msra.mxu0 %v1907_v34 }
 0x20b   :  { %1284 = vmatprep.subr.bf16.mxu0 %v1912_v35 }
 0x20e   :  { %1285 = vmatpush1.bf16.msra.mxu0 %v1910_v36  ;;  %v1076_v36 = vrot.slane %v1071_v31, %v2217_v1 }
 0x20f   :  { %1286 = vmatprep.subr.bf16.mxu0 %v1915_v37 }
 0x212   :  { %1287 = vmatpush1.bf16.msra.mxu0 %v1913_v38 }
 0x213   :  { %1288 = vmatprep.subr.bf16.mxu0 %v1918_v39 }
 0x216   :  { %1289 = vmatpush1.bf16.msra.mxu0 %v1916_v40 }
 0x217   :  { %1290 = vmatprep.subr.bf16.mxu0 %v1921_v41 }
 0x21a   :  { %1291 = vmatpush1.bf16.msra.mxu0 %v1919_v42 }
 0x21b   :  { %1292 = vmatprep.subr.bf16.mxu0 %v1924_v43 }
 0x21e   :  { %1293 = vmatpush1.bf16.msra.mxu0 %v1922_v44 }
 0x21f   :  { %1294 = vmatprep.subr.bf16.mxu0 %v1927_v45 }
 0x222   :  { %1295 = vmatpush1.bf16.msra.mxu0 %v1925_v46 }
 0x223   :  { %1296 = vmatprep.subr.bf16.mxu0 %v1930_v9 }
 0x226   :  { %1297 = vmatpush2.bf16.msra.mxu0 %v1928_v10 }
 0x227   :  { %1298 = vmatprep.subr.bf16.mxu0 %v1933_v11 }
 0x22a   :  { %1299 = vmatpush2.bf16.msra.mxu0 %v1931_v12 }
 0x22b   :  { %1300 = vmatprep.subr.bf16.mxu0 %v1936_v13 }
 0x22e   :  { %1301 = vmatpush2.bf16.msra.mxu0 %v1934_v14 }
 0x22f   :  { %1302 = vmatprep.subr.bf16.mxu0 %v1939_v15 }
 0x232   :  { %1303 = vmatpush2.bf16.msra.mxu0 %v1937_v16 }
 0x233   :  { %1304 = vmatprep.subr.bf16.mxu0 %v1942_v17 }
 0x236   :  { %1305 = vmatpush2.bf16.msra.mxu0 %v1940_v18 }
 0x237   :  { %1306 = vmatprep.subr.bf16.mxu0 %v1945_v19 }
 0x23a   :  { %1307 = vmatpush2.bf16.msra.mxu0 %v1943_v20 }
 0x23b   :  { %1308 = vmatprep.subr.bf16.mxu0 %v1948_v21 }
 0x23e   :  { %1309 = vmatpush2.bf16.msra.mxu0 %v1946_v22 }
 0x23f   :  { %1310 = vmatprep.subr.bf16.mxu0 %v1951_v23 }
 0x242   :  { %1311 = vmatpush2.bf16.msra.mxu0 %v1949_v24 }
 0x2c5   :  { %v744_v52 = vpop.f32.mrf.mxu0 }
 0x2c7   :  { %v746_v54 = vpop.f32.mrf.mxu0 }
 0x2c9   :  { %v748_v56 = vpop.f32.mrf.mxu0 }
 0x2ca   :  { %v753_v57 = vpack.c.bf16 %v748_v56, %v744_v52  ;;  %v1955_v52 = vld [vmem:[#allocation9 + $0x30] sm:$0xff]   ;;  %v1959_v56 = vld [vmem:[#allocation9 + $0x20] sm:$0xff]  }
 0x2cb   :  { %v750_v59 = vpop.f32.mrf.mxu0 }
 0x2cc   :  { %v792_v61 = vadd.bf16 %v784_v55, %v753_v57  ;;  %v754_v62 = vpack.c.bf16 %v750_v59, %v746_v54  ;;  %v1957_v54 = vld [vmem:[#allocation9 + $0x28] sm:$0xff]   ;;  %v1958_v55 = vld [vmem:[#allocation9 + $0x60] sm:$0xff]   ;;  %v1960_v57 = vld [vmem:[#allocation9 + $0x58] sm:$0xff]  }
 0x2cd   :  { %v1962_v59 = vld [vmem:[#allocation9 + $0x50] sm:$0xff]  }
 0x2ce   :  { %v794_v63 = vmul.bf16 1056980736, %v792_v61  ;;  %v793_v0 = vadd.bf16 %v791_v58, %v754_v62  ;;  %v1961_v58 = vld [vmem:[#allocation9 + $0x18] sm:$0xff]   ;;  %v1963_v61 = vld [vmem:[#allocation9 + $0x10] sm:$0xff]   ;;  %v1964_v62 = vld [vmem:[#allocation9 + $0x48] sm:$0xff]  }
 0x2d0   :  { %1976 = vtanh.bf16 %v794_v63  ;;  %v795_v2 = vmul.bf16 1056980736, %v793_v0  ;;  %v1966_v0 = vld [vmem:[#allocation9 + $0x40] sm:$0xff]  }
 0x2d2   :  { %1978 = vtanh.bf16 %v795_v2 }
 0x2de   :  { %v1977_v3 = vpop.eup %1976 }
 0x2df   :  { %v798_v5 = vadd.bf16 1065369472, %v1977_v3  ;;  %v1705_v3 = vld.sshfl [vmem:[%s2269_s10] sm:$0x11 pattern:$0x75316420] }
 0x2e0   :  { %v1979_v4 = vpop.eup %1978 }
 0x2e1   :  { %v799_v6 = vadd.bf16 1065369472, %v1979_v4  ;;  %v800_v8 = vmul.bf16 %v798_v5, %v794_v63  ;;  %v1965_v63 = vld [vmem:[#allocation9 + $0x8] sm:$0xff]   ;;  %v1333_v4 = vcombine.high %v1705_v3, %v1705_v3  ;;  %v1340_v5 = vrot.slane %v1705_v3, %v2213_v60 }
 0x2e3   :  { %v801_v7 = vmul.bf16 %v799_v6, %v795_v2  ;;  %v1967_v2 = vld [vmem:[#allocation9] sm:$0xff]   ;;  %v1347_v6 = vrot.slane %v1333_v4, %v2213_v60 }
 0x2e5   :  { %1027 = vmatprep.mubr.bf16.mxu1 %v801_v7  ;;  %v1349_v7 = vpack.i.b16 %v1340_v5, %v1340_v5  ;;  %v1356_v9 = vpack.i.b16 %v1347_v6, %v1347_v6 }
 0x2e6   :  { %1028 = vmatmul.mubr.bf16.vlgmr.msra.gmra.mxu1 %v800_v8 }
 0x2e7   :  { %1725 = vmatpush3.bf16.msra.mxu1 %v1953_v50  ;;  %v1354_v11 = vrot.slane %v1349_v7, %v2217_v1  ;;  %v1361_v14 = vrot.slane %v1356_v9, %v2217_v1 }
 0x2e8   :  { %1726 = vmatprep.subr.bf16.mxu1 %v1954_v51 }
 0x2eb   :  { %1727 = vmatpush3.bf16.msra.mxu1 %v1955_v52 }
 0x2ec   :  { %1728 = vmatprep.subr.bf16.mxu1 %v1956_v53 }
 0x2ef   :  { %1729 = vmatpush3.bf16.msra.mxu1 %v1957_v54 }
 0x2f0   :  { %1730 = vmatprep.subr.bf16.mxu1 %v1958_v55 }
 0x2f3   :  { %1731 = vmatpush3.bf16.msra.mxu1 %v1959_v56 }
 0x2f4   :  { %1732 = vmatprep.subr.bf16.mxu1 %v1960_v57 }
 0x2f7   :  { %1733 = vmatpush3.bf16.msra.mxu1 %v1961_v58 }
 0x2f8   :  { %1734 = vmatprep.subr.bf16.mxu1 %v1962_v59 }
 0x2fb   :  { %1735 = vmatpush3.bf16.msra.mxu1 %v1963_v61 }
 0x2fc   :  { %1736 = vmatprep.subr.bf16.mxu1 %v1964_v62 }
 0x2ff   :  { %1737 = vmatpush3.bf16.msra.mxu1 %v1965_v63 }
 0x300   :  { %1738 = vmatprep.subr.bf16.mxu1 %v1966_v0 }
 0x303   :  { %1739 = vmatpush3.bf16.msra.mxu1 %v1967_v2 }
 0x3a6   :  { %v1029_v30 = vpop.f32.mrf.mxu1 }
 0x3a8   :  { %v1031_v32 = vpop.f32.mrf.mxu1 }
 0x3aa   :  { %v1033_v34 = vpop.f32.mrf.mxu1 }
 0x3ab   :  { %v1038_v35 = vpack.c.bf16 %v1033_v34, %v1029_v30  ;;  %v1549_v34 = vrot.slane %v1544_v29, %v2217_v1 }
 0x3ac   :  { %v1035_v37 = vpop.f32.mrf.mxu1 }
 0x3ad   :  { %v1077_v38 = vadd.bf16 %v1069_v33, %v1038_v35  ;;  %v1039_v39 = vpack.c.bf16 %v1035_v37, %v1031_v32 }
 0x3af   :  { %v1079_v40 = vmul.bf16 1056980736, %v1077_v38  ;;  %v1078_v41 = vadd.bf16 %v1076_v36, %v1039_v39 }
 0x3b1   :  { %1980 = vtanh.bf16 %v1079_v40  ;;  %v1080_v42 = vmul.bf16 1056980736, %v1078_v41 }
 0x3b3   :  { %1982 = vtanh.bf16 %v1080_v42 }
 0x3bf   :  { %v1981_v43 = vpop.eup %1980 }
 0x3c0   :  { %v1083_v45 = vadd.bf16 1065369472, %v1981_v43 }
 0x3c1   :  { %v1983_v44 = vpop.eup %1982 }
 0x3c2   :  { %v1084_v46 = vadd.bf16 1065369472, %v1983_v44  ;;  %v1085_v48 = vmul.bf16 %v1083_v45, %v1079_v40 }
 0x3c4   :  { %v1086_v47 = vmul.bf16 %v1084_v46, %v1080_v42 }
 0x3c6   :  { %1312 = vmatprep.mubr.bf16.mxu0 %v1086_v47 }
 0x3c7   :  { %1313 = vmatmul.mubr.bf16.vlgmr.msra.gmra.mxu0 %v1085_v48 }
 0x487   :  { %v1314_v8 = vpop.f32.mrf.mxu0 }
 0x489   :  { %v1316_v10 = vpop.f32.mrf.mxu0 }
 0x48b   :  { %v1318_v12 = vpop.f32.mrf.mxu0 }
 0x48c   :  { %v1323_v13 = vpack.c.bf16 %v1318_v12, %v1314_v8 }
 0x48d   :  { %v1320_v15 = vpop.f32.mrf.mxu0 }
 0x48e   :  { %v1362_v16 = vadd.bf16 %v1354_v11, %v1323_v13  ;;  %v1324_v17 = vpack.c.bf16 %v1320_v15, %v1316_v10 }
 0x490   :  { %v1364_v18 = vmul.bf16 1056980736, %v1362_v16  ;;  %v1363_v19 = vadd.bf16 %v1361_v14, %v1324_v17 }
 0x492   :  { %1984 = vtanh.bf16 %v1364_v18  ;;  %v1365_v20 = vmul.bf16 1056980736, %v1363_v19 }
 0x494   :  { %1986 = vtanh.bf16 %v1365_v20 }
 0x4a0   :  { %v1985_v21 = vpop.eup %1984 }
 0x4a1   :  { %v1368_v22 = vadd.bf16 1065369472, %v1985_v21 }
 0x4a2   :  { %v1987_v60 = vpop.eup %1986 }
 0x4a3   :  { %v1369_v23 = vadd.bf16 1065369472, %v1987_v60  ;;  %v1370_v25 = vmul.bf16 %v1368_v22, %v1364_v18 }
 0x4a5   :  { %v1371_v24 = vmul.bf16 %v1369_v23, %v1365_v20 }
 0x4a7   :  { %1533 = vmatprep.mubr.bf16.mxu1 %v1371_v24 }
 0x4a8   :  { %1534 = vmatmul.mubr.bf16.vlgmr.msra.gmra.mxu1 %v1370_v25 }
 0x568   :  { %v1740_v26 = vpop.f32.mrf.mxu1 }
 0x56a   :  { %v1741_v28 = vpop.f32.mrf.mxu1 }
 0x56b   :  { %v1742_v32 = vadd.f32 %v1741_v28, %v1740_v26 }
 0x56c   :  { %v1743_v30 = vpop.f32.mrf.mxu1 }
 0x56e   :  { %v1744_v31 = vpop.f32.mrf.mxu1 }
 0x56f   :  { %v1745_v33 = vadd.f32 %v1744_v31, %v1743_v30 }
 0x571   :  { %v1542_v35 = vpack.c.bf16 %v1745_v33, %v1742_v32 }
 0x573   :  { %v1550_v36 = vadd.bf16 %v1549_v34, %v1542_v35 }
 0x575   :  { %1988 = vtanh.bf16 %v1550_v36 }
 0x583   :  { %v1989_v37 = vpop.eup %1988 }
 0x584   :  { %v1722_v38 = vcombine.low %v1989_v37, %v1989_v37  ;;  %v1723_v39 = vcombine.high %v1989_v37, %v1989_v37 }
 0x586   :  { %1559 = vst [vmem:[%s2272_s13] sm:$0xf] %v1722_v38  ;;  %1560 = vst [vmem:[%s2272_s13 + $0x4] sm:$0xf] %v1723_v39 }
 0x587   :  { %1565 = vsyncpa [#allocation3], 1 }
 0x588   :  { %1566 = vsyncpa [#allocation5], 1 }
 0x589   :  { %1567 = vsyncpa [#allocation8], 1 }

</bundles_post_ra>
